<compile_context>
chip_gen: v5e
topology: v5e:2x2
jax: 0.10.0
libtpu: 0.0.40
codegen_flags: <defaults>
</compile_context>

<pallas_src>
import functools
import math

import jax
import jax.numpy as jnp
from jax.experimental import pallas as pl
from jax.experimental.pallas import tpu as pltpu

LANE = 128


def _round_up(x, m):
    return ((x + m - 1) // m) * m


def _pick_tm(n):
    """Largest batch tile in {512, 256, 128} that keeps >= 2 grid steps."""
    for tm in (512, 256, 128):
        if n >= 2 * tm:
            return tm
    return n  # small batch: one tile covering the whole (possibly ragged) batch


# ---------------- fused Pallas kernel ----------------

def _fused_mlp_kernel(x_ref, lbl_ref, *refs, num_layers, num_classes, n_rows, tm):
    """One batch tile: full [Linear, (ReLU, Linear)*] chain + fused CE loss.

    refs = (w0, b0, ..., w_{L-1}, b_{L-1}, logits_out, loss_partial_out)
    Weights bf16 (in, out); biases f32 (1, out); accumulation in f32.
    """
    w_refs = [refs[2 * i] for i in range(num_layers)]
    b_refs = [refs[2 * i + 1] for i in range(num_layers)]
    logits_ref = refs[2 * num_layers]
    loss_ref = refs[2 * num_layers + 1]

    # f32 -> bf16 cast on the loaded tile (no HBM repack in the wrapper).
    a = x_ref[...].astype(jnp.bfloat16)
    acc = None
    for li in range(num_layers):
        if li > 0:
            # ReLU in f32 (v5e VPU has no bf16), then bf16 for the MXU.
            a = jnp.maximum(acc, 0.0).astype(jnp.bfloat16)
        acc = jnp.dot(a, w_refs[li][...], preferred_element_type=jnp.float32)
        acc = acc + b_refs[li][...]
    logits = acc                                      # f32 (tm, t_pad)
    logits_ref[...] = logits.astype(logits_ref.dtype)  # bf16 writeback

    # Fused cross-entropy on the in-register f32 logits.
    col = jax.lax.broadcasted_iota(jnp.int32, logits.shape, 1)
    z = jnp.where(col < num_classes, logits, -1e30)   # mask padded classes
    m = jnp.max(z, axis=-1, keepdims=True)
    lse = m + jnp.log(jnp.sum(jnp.exp(z - m), axis=-1, keepdims=True))
    picked = jnp.sum(jnp.where(col == lbl_ref[...], logits, 0.0),
                     axis=-1, keepdims=True)

    # Mask rows beyond the real batch (ragged last tile) and reduce in-kernel:
    # one f32 partial sum per tile instead of one loss per sample.
    row = pl.program_id(0) * tm + jax.lax.broadcasted_iota(
        jnp.int32, (logits.shape[0], 1), 0)
    per_row = jnp.where(row < n_rows, lse - picked, 0.0)
    loss_ref[...] = jnp.sum(per_row, axis=0, keepdims=True)


# ---------------- pallas_call wrapper ----------------

def fused_mlp(x2d, labels2d, padded_params, num_classes, tm):
    n, d = x2d.shape
    num_layers = len(padded_params)
    t_pad = padded_params[-1][0].shape[1]
    n_tiles = pl.cdiv(n, tm)

    in_specs = [
        pl.BlockSpec((tm, d), lambda i: (i, 0)),   # x tile, f32 straight from HBM
        pl.BlockSpec((tm, 1), lambda i: (i, 0)),   # labels tile (int32)
    ]
    flat_params = []
    flops = 0
    bytes_accessed = x2d.size * 4 + labels2d.size * 4
    for (w, b) in padded_params:
        # Constant block index -> weights/biases stay resident in VMEM.
        in_specs.append(pl.BlockSpec(w.shape, lambda i: (0, 0)))
        in_specs.append(pl.BlockSpec(b.shape, lambda i: (0, 0)))
        flat_params += [w, b]
        flops += 2 * n * w.shape[0] * w.shape[1]
        bytes_accessed += w.size * 2 + b.size * 4

    out_shape = (
        jax.ShapeDtypeStruct((n, t_pad), jnp.bfloat16),    # bf16 padded logits
        jax.ShapeDtypeStruct((n_tiles, 1), jnp.float32),   # per-tile loss partial sums
    )
    out_specs = (
        pl.BlockSpec((tm, t_pad), lambda i: (i, 0)),
        pl.BlockSpec((1, 1), lambda i: (i, 0)),
    )
    bytes_accessed += n * t_pad * 2 + n_tiles * 4

    kernel = functools.partial(
        _fused_mlp_kernel, num_layers=num_layers, num_classes=num_classes,
        n_rows=n, tm=tm)

    return pl.pallas_call(
        kernel,
        out_shape=out_shape,
        grid=(n_tiles,),
        in_specs=in_specs,
        out_specs=out_specs,
        compiler_params=pltpu.CompilerParams(
            dimension_semantics=("parallel",),        # batch tiles independent
            vmem_limit_bytes=32 * 1024 * 1024,        # safe on v5e/v6e/v7x
        ),
        cost_estimate=pl.CostEstimate(
            flops=flops,
            transcendentals=n * t_pad,
            bytes_accessed=bytes_accessed,
        ),
    )(x2d, labels2d, *flat_params)


# ---------------- parameter init (mirrors nn.Linear default) ----------------

def init_params(key, data_shape, hidden_size, target_size):
    d = int(math.prod(data_shape))
    sizes = [d] + list(hidden_size) + [target_size]
    params = []
    for fan_in, fan_out in zip(sizes[:-1], sizes[1:]):
        key, kw, kb = jax.random.split(key, 3)
        bound = 1.0 / math.sqrt(fan_in)
        w = jax.random.uniform(kw, (fan_in, fan_out), jnp.float32, -bound, bound)
        b = jax.random.uniform(kb, (1, fan_out), jnp.float32, -bound, bound)
        params.append((w, b))
    return params


# ---------------- forward (glue: fold norm, pad tiny dims, call kernel) ------

def mlp_forward(params, inputs, stats, *, norm=True):
    x = inputs["data"]  # NCHW, f32
    n, c, h, w = x.shape
    d = c * h * w
    mean_c, std_c = stats

    xf = x.reshape(n, d).astype(jnp.float32)   # x.view(x.size(0), -1); free reshape

    # Fold per-channel normalization into the first Linear (static bool flag),
    # done in f32 before the bf16 cast.
    w0, b0 = params[0]
    if norm:
        mean = jnp.broadcast_to(mean_c.reshape(c, 1, 1), (c, h, w)).reshape(1, d)
        invstd = 1.0 / jnp.broadcast_to(std_c.reshape(c, 1, 1), (c, h, w)).reshape(1, d)
        w0 = invstd.reshape(d, 1) * w0
        b0 = b0 - jnp.dot(mean * invstd, params[0][0])
    folded = [(w0, b0)] + list(params[1:])

    # Pad only the (tiny) hidden/class dims to one lane multiple (128); the
    # input feature dim is never padded (block dim == full array dim is legal).
    padded_params = []
    in_dim = d
    for (wi, bi) in folded:
        fi, fo = wi.shape
        fo_pad = _round_up(fo, LANE)
        wp = jnp.zeros((in_dim, fo_pad), jnp.float32).at[:fi, :fo].set(wi)
        bp = jnp.zeros((1, fo_pad), jnp.float32).at[:, :fo].set(bi)
        padded_params.append((wp.astype(jnp.bfloat16), bp))
        in_dim = fo_pad

    labels2d = inputs["target"].astype(jnp.int32).reshape(n, 1)

    tm = _pick_tm(n)
    target_size = params[-1][0].shape[1]
    logits_pad, loss_partials = fused_mlp(
        xf, labels2d, padded_params, target_size, tm)

    # bf16 logits (loss was computed from the f32 values in-kernel).
    output = {"target": logits_pad[:, :target_size]}
    output["loss"] = jnp.sum(loss_partials) / n
    return output


# ---------------- demo ----------------

if __name__ == "__main__":
    key = jax.random.PRNGKey(0)
    data_shape = (4, 16, 16)   # C, H, W
    hidden_size = [32, 32]
    target_size = 10
    batch = 2

    kd, kl, kp = jax.random.split(key, 3)
    data = jax.random.normal(kd, (batch,) + data_shape, jnp.float32)
    labels = jax.random.randint(kl, (batch,), 0, target_size)
    params = init_params(kp, data_shape, hidden_size, target_size)

    # Deterministic per-channel stats standing in for cfg['stats'][cfg['data_name']].
    stats = (
        jnp.full((data_shape[0],), 0.5, jnp.float32),   # mean
        jnp.full((data_shape[0],), 0.25, jnp.float32),  # std
    )

    inputs = {"data": data, "target": labels}
    out = mlp_forward(params, inputs, stats, norm=True)
    jax.block_until_ready(out)

    assert out["target"].shape == (batch, target_size)
    assert out["loss"].shape == ()
    assert bool(jnp.isfinite(out["loss"]))
    print("KERNEL_OK")
</pallas_src>

<mosaic_0001>
module attributes {stable_mosaic.version = 11 : i64} {
  func.func @_fused_mlp_kernel(%arg0: i32, %arg1: memref<2x1024xf32, #tpu.memory_space<vmem>>, %arg2: memref<2x1xi32, #tpu.memory_space<vmem>>, %arg3: memref<1024x128xbf16, #tpu.memory_space<vmem>>, %arg4: memref<1x128xf32, #tpu.memory_space<vmem>>, %arg5: memref<128x128xbf16, #tpu.memory_space<vmem>>, %arg6: memref<1x128xf32, #tpu.memory_space<vmem>>, %arg7: memref<128x128xbf16, #tpu.memory_space<vmem>>, %arg8: memref<1x128xf32, #tpu.memory_space<vmem>>, %arg9: memref<2x128xbf16, #tpu.memory_space<vmem>>, %arg10: memref<1x1xf32, #tpu.memory_space<vmem>>) attributes {dimension_semantics = [#tpu.dimension_semantics<parallel>], iteration_bounds = array<i64: 1>, scalar_prefetch = 0 : i64, scratch_operands = 0 : i64, tpu.core_type = #tpu.core_type<tc>, window_params = [{transform_indices = @transform_0, window_bounds = array<i64: 2, 1024>}, {transform_indices = @transform_1, window_bounds = array<i64: 2, 1>}, {pipeline_mode = #tpu.pipeline_mode<synchronous>, transform_indices = @transform_2, window_bounds = array<i64: 1024, 128>}, {pipeline_mode = #tpu.pipeline_mode<synchronous>, transform_indices = @transform_3, window_bounds = array<i64: 1, 128>}, {pipeline_mode = #tpu.pipeline_mode<synchronous>, transform_indices = @transform_4, window_bounds = array<i64: 128, 128>}, {pipeline_mode = #tpu.pipeline_mode<synchronous>, transform_indices = @transform_5, window_bounds = array<i64: 1, 128>}, {pipeline_mode = #tpu.pipeline_mode<synchronous>, transform_indices = @transform_6, window_bounds = array<i64: 128, 128>}, {pipeline_mode = #tpu.pipeline_mode<synchronous>, transform_indices = @transform_7, window_bounds = array<i64: 1, 128>}, {transform_indices = @transform_8, window_bounds = array<i64: 2, 128>}, {transform_indices = @transform_9, window_bounds = array<i64: 1, 1>}]} {
    %c0 = arith.constant 0 : index
    %c0_0 = arith.constant 0 : index
    %0 = vector.load %arg1[%c0, %c0_0] : memref<2x1024xf32, #tpu.memory_space<vmem>>, vector<2x1024xf32>
    %1 = arith.truncf %0 : vector<2x1024xf32> to vector<2x1024xbf16>
    %c0_1 = arith.constant 0 : index
    %c0_2 = arith.constant 0 : index
    %2 = vector.load %arg3[%c0_1, %c0_2] : memref<1024x128xbf16, #tpu.memory_space<vmem>>, vector<1024x128xbf16>
    %cst = arith.constant dense<0.000000e+00> : vector<2x128xf32>
    %3 = tpu.matmul %1, %2, %cst {dimension_numbers = #tpu.dot_dimension_numbers<[1], [0], [0], [1], [0, 0, 1, 1], [], []>} : vector<2x1024xbf16>, vector<1024x128xbf16>, vector<2x128xf32> -> vector<2x128xf32>
    %c0_3 = arith.constant 0 : index
    %c0_4 = arith.constant 0 : index
    %4 = vector.load %arg4[%c0_3, %c0_4] : memref<1x128xf32, #tpu.memory_space<vmem>>, vector<1x128xf32>
    %5 = vector.broadcast %4 : vector<1x128xf32> to vector<2x128xf32>
    %6 = arith.addf %3, %5 : vector<2x128xf32>
    %cst_5 = arith.constant 0.000000e+00 : f32
    %7 = vector.broadcast %cst_5 : f32 to vector<2x128xf32>
    %8 = arith.maximumf %6, %7 : vector<2x128xf32>
    %9 = arith.truncf %8 : vector<2x128xf32> to vector<2x128xbf16>
    %c0_6 = arith.constant 0 : index
    %c0_7 = arith.constant 0 : index
    %10 = vector.load %arg5[%c0_6, %c0_7] : memref<128x128xbf16, #tpu.memory_space<vmem>>, vector<128x128xbf16>
    %cst_8 = arith.constant dense<0.000000e+00> : vector<2x128xf32>
    %11 = tpu.matmul %9, %10, %cst_8 {dimension_numbers = #tpu.dot_dimension_numbers<[1], [0], [0], [1], [0, 0, 1, 1], [], []>} : vector<2x128xbf16>, vector<128x128xbf16>, vector<2x128xf32> -> vector<2x128xf32>
    %c0_9 = arith.constant 0 : index
    %c0_10 = arith.constant 0 : index
    %12 = vector.load %arg6[%c0_9, %c0_10] : memref<1x128xf32, #tpu.memory_space<vmem>>, vector<1x128xf32>
    %13 = vector.broadcast %12 : vector<1x128xf32> to vector<2x128xf32>
    %14 = arith.addf %11, %13 : vector<2x128xf32>
    %cst_11 = arith.constant 0.000000e+00 : f32
    %15 = vector.broadcast %cst_11 : f32 to vector<2x128xf32>
    %16 = arith.maximumf %14, %15 : vector<2x128xf32>
    %17 = arith.truncf %16 : vector<2x128xf32> to vector<2x128xbf16>
    %c0_12 = arith.constant 0 : index
    %c0_13 = arith.constant 0 : index
    %18 = vector.load %arg7[%c0_12, %c0_13] : memref<128x128xbf16, #tpu.memory_space<vmem>>, vector<128x128xbf16>
    %cst_14 = arith.constant dense<0.000000e+00> : vector<2x128xf32>
    %19 = tpu.matmul %17, %18, %cst_14 {dimension_numbers = #tpu.dot_dimension_numbers<[1], [0], [0], [1], [0, 0, 1, 1], [], []>} : vector<2x128xbf16>, vector<128x128xbf16>, vector<2x128xf32> -> vector<2x128xf32>
    %c0_15 = arith.constant 0 : index
    %c0_16 = arith.constant 0 : index
    %20 = vector.load %arg8[%c0_15, %c0_16] : memref<1x128xf32, #tpu.memory_space<vmem>>, vector<1x128xf32>
    %21 = vector.broadcast %20 : vector<1x128xf32> to vector<2x128xf32>
    %22 = arith.addf %19, %21 : vector<2x128xf32>
    %23 = arith.truncf %22 : vector<2x128xf32> to vector<2x128xbf16>
    %c0_17 = arith.constant 0 : index
    %c0_18 = arith.constant 0 : index
    %24 = vector.load %arg9[%c0_17, %c0_18] : memref<2x128xbf16, #tpu.memory_space<vmem>>, vector<2x128xbf16>
    tpu.vector_store %arg9[%c0_17, %c0_18], %23 {strides = array<i32>} : memref<2x128xbf16, #tpu.memory_space<vmem>>, vector<2x128xbf16>,
    %25 = tpu.iota {dimensions = array<i32: 1>} : vector<2x128xi32>
    %c10_i32 = arith.constant 10 : i32
    %26 = vector.broadcast %c10_i32 : i32 to vector<2x128xi32>
    %27 = arith.cmpi slt, %25, %26 : vector<2x128xi32>
    %cst_19 = arith.constant -1.000000e+30 : f32
    %28 = vector.broadcast %cst_19 : f32 to vector<2x128xf32>
    %29 = arith.select %27, %22, %28 : vector<2x128xi1>, vector<2x128xf32>
    %cst_20 = arith.constant dense<0xFF800000> : vector<2xf32>
    %30 = vector.multi_reduction <maximumf>, %29, %cst_20 [1] : vector<2x128xf32> to vector<2xf32>
    %31 = vector.shape_cast %30 : vector<2xf32> to vector<2x1xf32>
    %32 = vector.broadcast %31 : vector<2x1xf32> to vector<2x128xf32>
    %33 = arith.subf %29, %32 : vector<2x128xf32>
    %34 = math.exp %33 : vector<2x128xf32>
    %cst_21 = arith.constant dense<0.000000e+00> : vector<2xf32>
    %35 = vector.multi_reduction <add>, %34, %cst_21 [1] : vector<2x128xf32> to vector<2xf32>
    %36 = vector.shape_cast %35 : vector<2xf32> to vector<2x1xf32>
    %37 = math.log %36 : vector<2x1xf32>
    %38 = arith.addf %31, %37 : vector<2x1xf32>
    %c0_22 = arith.constant 0 : index
    %c0_23 = arith.constant 0 : index
    %39 = vector.load %arg2[%c0_22, %c0_23] : memref<2x1xi32, #tpu.memory_space<vmem>>, vector<2x1xi32>
    %40 = vector.broadcast %39 : vector<2x1xi32> to vector<2x128xi32>
    %41 = arith.cmpi eq, %25, %40 : vector<2x128xi32>
    %cst_24 = arith.constant 0.000000e+00 : f32
    %42 = vector.broadcast %cst_24 : f32 to vector<2x128xf32>
    %43 = arith.select %41, %22, %42 : vector<2x128xi1>, vector<2x128xf32>
    %cst_25 = arith.constant dense<0.000000e+00> : vector<2xf32>
    %44 = vector.multi_reduction <add>, %43, %cst_25 [1] : vector<2x128xf32> to vector<2xf32>
    %45 = vector.shape_cast %44 : vector<2xf32> to vector<2x1xf32>
    %c2_i32 = arith.constant 2 : i32
    %46 = arith.muli %arg0, %c2_i32 : i32
    %47 = tpu.iota {dimensions = array<i32: 0>} : vector<2x1xi32>
    %48 = vector.broadcast %46 : i32 to vector<2x1xi32>
    %49 = arith.addi %48, %47 : vector<2x1xi32>
    %c2_i32_26 = arith.constant 2 : i32
    %50 = vector.broadcast %c2_i32_26 : i32 to vector<2x1xi32>
    %51 = arith.cmpi slt, %49, %50 : vector<2x1xi32>
    %52 = arith.subf %38, %45 : vector<2x1xf32>
    %cst_27 = arith.constant 0.000000e+00 : f32
    %53 = vector.broadcast %cst_27 : f32 to vector<2x1xf32>
    %54 = arith.select %51, %52, %53 : vector<2x1xi1>, vector<2x1xf32>
    %cst_28 = arith.constant dense<0.000000e+00> : vector<1xf32>
    %55 = vector.multi_reduction <add>, %54, %cst_28 [0] : vector<2x1xf32> to vector<1xf32>
    %56 = vector.shape_cast %55 : vector<1xf32> to vector<1x1xf32>
    %c0_29 = arith.constant 0 : index
    %c0_30 = arith.constant 0 : index
    %57 = vector.load %arg10[%c0_29, %c0_30] : memref<1x1xf32, #tpu.memory_space<vmem>>, vector<1x1xf32>
    tpu.vector_store %arg10[%c0_29, %c0_30], %56 {strides = array<i32>} : memref<1x1xf32, #tpu.memory_space<vmem>>, vector<1x1xf32>,
    return
  }
  func.func @transform_0(%arg0: i32) -> (i32, i32) {
    %c0_i32 = arith.constant 0 : i32
    %c0_i32_0 = arith.constant 0 : i32
    return %arg0, %c0_i32 : i32, i32
  }
  func.func @transform_1(%arg0: i32) -> (i32, i32) {
    %c0_i32 = arith.constant 0 : i32
    %c0_i32_0 = arith.constant 0 : i32
    return %arg0, %c0_i32 : i32, i32
  }
  func.func @transform_2(%arg0: i32) -> (i32, i32) {
    %c0_i32 = arith.constant 0 : i32
    %c0_i32_0 = arith.constant 0 : i32
    %c0_i32_1 = arith.constant 0 : i32
    return %c0_i32, %c0_i32_0 : i32, i32
  }
  func.func @transform_3(%arg0: i32) -> (i32, i32) {
    %c0_i32 = arith.constant 0 : i32
    %c0_i32_0 = arith.constant 0 : i32
    %c0_i32_1 = arith.constant 0 : i32
    return %c0_i32, %c0_i32_0 : i32, i32
  }
  func.func @transform_4(%arg0: i32) -> (i32, i32) {
    %c0_i32 = arith.constant 0 : i32
    %c0_i32_0 = arith.constant 0 : i32
    %c0_i32_1 = arith.constant 0 : i32
    return %c0_i32, %c0_i32_0 : i32, i32
  }
  func.func @transform_5(%arg0: i32) -> (i32, i32) {
    %c0_i32 = arith.constant 0 : i32
    %c0_i32_0 = arith.constant 0 : i32
    %c0_i32_1 = arith.constant 0 : i32
    return %c0_i32, %c0_i32_0 : i32, i32
  }
  func.func @transform_6(%arg0: i32) -> (i32, i32) {
    %c0_i32 = arith.constant 0 : i32
    %c0_i32_0 = arith.constant 0 : i32
    %c0_i32_1 = arith.constant 0 : i32
    return %c0_i32, %c0_i32_0 : i32, i32
  }
  func.func @transform_7(%arg0: i32) -> (i32, i32) {
    %c0_i32 = arith.constant 0 : i32
    %c0_i32_0 = arith.constant 0 : i32
    %c0_i32_1 = arith.constant 0 : i32
    return %c0_i32, %c0_i32_0 : i32, i32
  }
  func.func @transform_8(%arg0: i32) -> (i32, i32) {
    %c0_i32 = arith.constant 0 : i32
    %c0_i32_0 = arith.constant 0 : i32
    return %arg0, %c0_i32 : i32, i32
  }
  func.func @transform_9(%arg0: i32) -> (i32, i32) {
    %c0_i32 = arith.constant 0 : i32
    %c0_i32_0 = arith.constant 0 : i32
    return %arg0, %c0_i32 : i32, i32
  }
}

</mosaic_0001>

<bundles_post_ra>
// kernel: tpu_custom_call.1
= control target key start
LH: loop header
LB: loop body
LE: loop exit
PB: predicated region body
PF: predicated region fallthrough
CT: control target
= control target key end

     0   :  { %15 = vsyncpa [#allocation3], 0  ;;  %s1655_s0 = inlined_call_operand.hbm [shape: f32[2,1024], index: 0, kind: input, shape index: {}]   ;;  %s1656_s1 = inlined_call_operand.vmem [shape: s32[2,1], index: 1, kind: input, shape index: {}]   ;;  %s1657_s2 = inlined_call_operand.hbm [shape: bf16[1024,128], index: 2, kind: input, shape index: {}]   ;;  %s1658_s3 = inlined_call_operand.vmem [shape: f32[1,128], index: 3, kind: input, shape index: {}]   ;;  %s1659_s4 = inlined_call_operand.hbm [shape: bf16[128,128], index: 4, kind: input, shape index: {}]   ;;  %s1660_s5 = inlined_call_operand.vmem [shape: f32[1,128], index: 5, kind: input, shape index: {}]   ;;  %s1661_s6 = inlined_call_operand.hbm [shape: bf16[128,128], index: 6, kind: input, shape index: {}]   ;;  %s1662_s7 = inlined_call_operand.vmem [shape: f32[1,128], index: 7, kind: input, shape index: {}]   ;;  %s1663_s8 = inlined_call_operand.hbm [shape: bf16[2,128], index: 8, kind: output, shape index: {0}]   ;;  %s1664_s9 = inlined_call_operand.hbm [shape: f32[1,1], index: 9, kind: output, shape index: {1}]  }
   0x1   :  { %16 = vsyncpa [#allocation6], 0 }
   0x2   :  { %17 = vsyncpa [#allocation9], 0 }
   0x3   :  { %18 = vsyncpa [#allocation4], 0  ;;  %s37_s11 = sshll.u32 %s1657_s2, 4  ;;  %s38_s11 = int_to_ptr.hbm [resolvable:$true] %s37_s11 }
   0x4   :  { %19 = vsyncpa [#allocation12], 0  ;;  %s1562_s12 = smov [#allocation5]   ;;  %s25_s16 = sshll.u32 %s1655_s0, 4  ;;  %s26_s16 = int_to_ptr.hbm [resolvable:$true] %s25_s16 }
   0x5   :  { %s39_s13 = sshll.u32 %s1562_s12, 4  ;;  %s1563_s17 = smov 64   ;;  %s40_s13 = int_to_ptr.vmem [resolvable:$true] %s39_s13 }
   0x6   :  { %s1564_s18 = smov 4   ;;  %s1565_s19 = smov [#allocation2]  }
   0x7   :  { %45 = dma.hbm_to_vmem [thread:$0]  %s38_s11, 8192, %s40_s13, [#allocation6], %s1563_s17, %s1563_s17, %s1564_s18  }
   0x8   :  { %s27_s20 = sshll.u32 %s1565_s19, 4  ;;  %s52_s23 = sshll.u32 %s1659_s4, 4  ;;  %s28_s20 = int_to_ptr.vmem [resolvable:$true] %s27_s20  ;;  %s53_s23 = int_to_ptr.hbm [resolvable:$true] %s52_s23 }
   0x9   :  { %30 = dma.hbm_to_vmem [thread:$0]  %s26_s16, 256, %s28_s20, [#allocation3]  }
   0xa   :  { %s67_s25 = sshll.u32 %s1661_s6, 4  ;;  %s1566_s26 = smov [#allocation7]   ;;  %s68_s25 = int_to_ptr.hbm [resolvable:$true] %s67_s25 }
   0xb   :  { %s54_s27 = sshll.u32 %s1566_s26, 4  ;;  %s1567_s0 = smov [#allocation8]   ;;  %s55_s27 = int_to_ptr.vmem [resolvable:$true] %s54_s27 }
   0xc   :  { %60 = dma.hbm_to_vmem [thread:$0]  %s53_s23, 1024, %s55_s27, [#allocation6], %s1563_s17, %s1563_s17, %s1564_s18  }
   0xd   :  { %s69_s28 = sshll.u32 %s1567_s0, 4  ;;  %s70_s28 = int_to_ptr.vmem [resolvable:$true] %s69_s28 }
   0xe   :  { %75 = dma.hbm_to_vmem [thread:$0]  %s68_s25, 1024, %s70_s28, [#allocation9], %s1563_s17, %s1563_s17, %s1564_s18  }
   0xf   :  { %1552 = dma.done.wait [#allocation3], 256  }
  0x10   :  { %1553 = vsyncadd [#allocation3], 4294967040 }
  0x11   :  { %1554 = dma.done.wait [#allocation6], 9216  }
  0x12   :  { %1555 = vsyncadd [#allocation6], 4294958080 }
  0x13   :  { %1556 = dma.done.wait [#allocation9], 1024  }
  0x14   :  { %1557 = vsyncadd [#allocation9], 4294966272  ;;  %v1318_v0 = vld [vmem:[#allocation5 + $0x38] sm:$0xff]  ;;  %v1317_v4 = vld [vmem:[#allocation5 + $0x30] sm:$0xff]  ;;  %vm917_vm1 = vcmask 1041408   ;;  %s963_s13 = sshll.u32 %s1663_s8, 4  ;;  %s964_s13 = int_to_ptr.hbm [resolvable:$true] %s963_s13 }
  0x15   :  { %v1326_v1 = vld [vmem:[#allocation5 + $0x78] sm:$0xff]  ;;  %641 = vmatpush.bf16.msra.mxu0 %v1318_v0  ;;  %v1325_v5 = vld [vmem:[#allocation5 + $0x70] sm:$0xff]  ;;  %v1316_v8 = vld [vmem:[#allocation5 + $0x28] sm:$0xff]  ;;  %s1570_s8 = smov [#allocation11]   ;;  %s974_s18 = sshll.u32 %s1664_s9, 4  ;;  %vm954_vm4 = vcmask 0   ;;  %s975_s18 = int_to_ptr.hbm [resolvable:$true] %s974_s18 }
  0x16   :  { %v1334_v2 = vld [vmem:[#allocation5 + $0xb8] sm:$0xff]  ;;  %654 = vmatpush.bf16.msra.mxu1 %v1326_v1  ;;  %v1333_v6 = vld [vmem:[#allocation5 + $0xb0] sm:$0xff]  ;;  %v1324_v9 = vld [vmem:[#allocation5 + $0x68] sm:$0xff]  ;;  %s972_s15 = sshll.u32 %s1570_s8, 4  ;;  %s973_s15 = int_to_ptr.vmem [resolvable:$true] %s972_s15 }
  0x17   :  { %v1342_v3 = vld [vmem:[#allocation5 + $0xf8] sm:$0xff]  ;;  %667 = vmatpush.bf16.msra.mxu2 %v1334_v2  ;;  %v1341_v7 = vld [vmem:[#allocation5 + $0xf0] sm:$0xff]  ;;  %v1332_v10 = vld [vmem:[#allocation5 + $0xa8] sm:$0xff] }
  0x18   :  { %680 = vmatpush.bf16.msra.mxu3 %v1342_v3  ;;  %v1340_v11 = vld [vmem:[#allocation5 + $0xe8] sm:$0xff]  ;;  %v1315_v12 = vld [vmem:[#allocation5 + $0x20] sm:$0xff]  ;;  %v94_v16 = vld [vmem:[#allocation2] sm:$0xff] }
  0x19   :  { %642 = vmatpush.bf16.msra.mxu0 %v1317_v4  ;;  %v1323_v13 = vld [vmem:[#allocation5 + $0x60] sm:$0xff]  ;;  %v1314_v17 = vld [vmem:[#allocation5 + $0x18] sm:$0xff]  ;;  %98 = vst [vmem:[#allocation1] ss:$4 sm:$0xff] %v94_v16  ;;  %v1313_v21 = vld [vmem:[#allocation5 + $0x10] sm:$0xff] }
  0x1a   :  { %655 = vmatpush.bf16.msra.mxu1 %v1325_v5  ;;  %v1331_v14 = vld [vmem:[#allocation5 + $0xa0] sm:$0xff]  ;;  %v1322_v18 = vld [vmem:[#allocation5 + $0x58] sm:$0xff]  ;;  %v1321_v22 = vld [vmem:[#allocation5 + $0x50] sm:$0xff] }
  0x1b   :  { %668 = vmatpush.bf16.msra.mxu2 %v1333_v6  ;;  %v1339_v15 = vld [vmem:[#allocation5 + $0xe0] sm:$0xff]  ;;  %v1330_v19 = vld [vmem:[#allocation5 + $0x98] sm:$0xff]  ;;  %v1329_v23 = vld [vmem:[#allocation5 + $0x90] sm:$0xff] }
  0x1c   :  { %681 = vmatpush.bf16.msra.mxu3 %v1341_v7  ;;  %v1338_v20 = vld [vmem:[#allocation5 + $0xd8] sm:$0xff]  ;;  %v1337_v24 = vld [vmem:[#allocation5 + $0xd0] sm:$0xff]  ;;  %v1312_v25 = vld [vmem:[#allocation5 + $0x8] sm:$0xff] }
  0x1d   :  { %643 = vmatpush.bf16.msra.mxu0 %v1316_v8  ;;  %v1320_v26 = vld [vmem:[#allocation5 + $0x48] sm:$0xff]  ;;  %v95_v29 = vld [vmem:[#allocation2 + $0x8] sm:$0xff]  ;;  %v1311_v30 = vld [vmem:[#allocation5] sm:$0xff] }
  0x1e   :  { %656 = vmatpush.bf16.msra.mxu1 %v1324_v9  ;;  %v1328_v27 = vld [vmem:[#allocation5 + $0x88] sm:$0xff]  ;;  %v1319_v31 = vld [vmem:[#allocation5 + $0x40] sm:$0xff]  ;;  %100 = vst [vmem:[#allocation1 + $0x20] ss:$4 sm:$0xff] %v95_v29  ;;  %v1350_v34 = vld [vmem:[#allocation5 + $0x138] sm:$0xff] }
  0x1f   :  { %669 = vmatpush.bf16.msra.mxu2 %v1332_v10  ;;  %v1336_v28 = vld [vmem:[#allocation5 + $0xc8] sm:$0xff]  ;;  %v1327_v32 = vld [vmem:[#allocation5 + $0x80] sm:$0xff]  ;;  %v1358_v35 = vld [vmem:[#allocation5 + $0x178] sm:$0xff] }
  0x20   :  { %682 = vmatpush.bf16.msra.mxu3 %v1340_v11  ;;  %v1335_v33 = vld [vmem:[#allocation5 + $0xc0] sm:$0xff]  ;;  %v103_v36 = vld.sshfl [vmem:[#allocation1 + $0x10] sm:$0xff pattern:$0x73625140]  ;;  %v1349_v46 = vld [vmem:[#allocation5 + $0x130] sm:$0xff] }
  0x21   :  { %644 = vmatpush.bf16.msra.mxu0 %v1315_v12  ;;  %v101_v37 = vld.sshfl [vmem:[#allocation1] sm:$0xff pattern:$0x73625140]  ;;  %v104_v38 = vld.sshfl [vmem:[#allocation1 + $0x18] sm:$0xff pattern:$0x73625140]  ;;  %v119_v42 = vpack.c.bf16 %v103_v36, %v103_v36 }
  0x22   :  { %657 = vmatpush.bf16.msra.mxu1 %v1323_v13  ;;  %v102_v39 = vld.sshfl [vmem:[#allocation1 + $0x8] sm:$0xff pattern:$0x73625140]  ;;  %v1366_v40 = vld [vmem:[#allocation5 + $0x1b8] sm:$0xff]  ;;  %v117_v43 = vpack.c.bf16 %v101_v37, %v101_v37  ;;  %v120_v44 = vpack.c.bf16 %v104_v38, %v104_v38  ;;  %v1348_v50 = vld [vmem:[#allocation5 + $0x128] sm:$0xff] }
  0x23   :  { %670 = vmatpush.bf16.msra.mxu2 %v1331_v14  ;;  %v1374_v41 = vld [vmem:[#allocation5 + $0x1f8] sm:$0xff]  ;;  %v118_v45 = vpack.c.bf16 %v102_v39, %v102_v39  ;;  %v1357_v47 = vld [vmem:[#allocation5 + $0x170] sm:$0xff]  ;;  %v1356_v51 = vld [vmem:[#allocation5 + $0x168] sm:$0xff] }
  0x24   :  { %683 = vmatpush.bf16.msra.mxu3 %v1339_v15  ;;  %v1365_v48 = vld [vmem:[#allocation5 + $0x1b0] sm:$0xff]  ;;  %v1364_v52 = vld [vmem:[#allocation5 + $0x1a8] sm:$0xff]  ;;  %v1347_v54 = vld [vmem:[#allocation5 + $0x120] sm:$0xff] }
  0x25   :  { %645 = vmatpush.bf16.msra.mxu0 %v1314_v17  ;;  %v1373_v49 = vld [vmem:[#allocation5 + $0x1f0] sm:$0xff]  ;;  %v1372_v53 = vld [vmem:[#allocation5 + $0x1e8] sm:$0xff]  ;;  %v1355_v55 = vld [vmem:[#allocation5 + $0x160] sm:$0xff] }
  0x26   :  { %658 = vmatpush.bf16.msra.mxu1 %v1322_v18  ;;  %v1363_v56 = vld [vmem:[#allocation5 + $0x1a0] sm:$0xff]  ;;  %v1346_v58 = vld [vmem:[#allocation5 + $0x118] sm:$0xff]  ;;  %v1345_v62 = vld [vmem:[#allocation5 + $0x110] sm:$0xff] }
  0x27   :  { %671 = vmatpush.bf16.msra.mxu2 %v1330_v19  ;;  %v1371_v57 = vld [vmem:[#allocation5 + $0x1e0] sm:$0xff]  ;;  %v1354_v59 = vld [vmem:[#allocation5 + $0x158] sm:$0xff]  ;;  %v1353_v63 = vld [vmem:[#allocation5 + $0x150] sm:$0xff] }
  0x28   :  { %684 = vmatpush.bf16.msra.mxu3 %v1338_v20  ;;  %v1362_v60 = vld [vmem:[#allocation5 + $0x198] sm:$0xff]  ;;  %v1361_v0 = vld [vmem:[#allocation5 + $0x190] sm:$0xff]  ;;  %v1344_v2 = vld [vmem:[#allocation5 + $0x108] sm:$0xff] }
  0x29   :  { %646 = vmatpush.bf16.msra.mxu0 %v1313_v21  ;;  %v1370_v61 = vld [vmem:[#allocation5 + $0x1d8] sm:$0xff]  ;;  %v1369_v1 = vld [vmem:[#allocation5 + $0x1d0] sm:$0xff]  ;;  %v1352_v3 = vld [vmem:[#allocation5 + $0x148] sm:$0xff] }
  0x2a   :  { %659 = vmatpush.bf16.msra.mxu1 %v1321_v22  ;;  %v1360_v4 = vld [vmem:[#allocation5 + $0x188] sm:$0xff]  ;;  %v1343_v6 = vld [vmem:[#allocation5 + $0x100] sm:$0xff]  ;;  %v106_v11 = vld.sshfl [vmem:[#allocation1 + $0x28] sm:$0xff pattern:$0x73625140] }
  0x2b   :  { %672 = vmatpush.bf16.msra.mxu2 %v1329_v23  ;;  %v1368_v5 = vld [vmem:[#allocation5 + $0x1c8] sm:$0xff]  ;;  %v1351_v7 = vld [vmem:[#allocation5 + $0x140] sm:$0xff]  ;;  %v107_v12 = vld.sshfl [vmem:[#allocation1 + $0x30] sm:$0xff pattern:$0x73625140]  ;;  %v122_v15 = vpack.c.bf16 %v106_v11, %v106_v11 }
  0x2c   :  { %685 = vmatpush.bf16.msra.mxu3 %v1337_v24  ;;  %v1359_v8 = vld [vmem:[#allocation5 + $0x180] sm:$0xff]  ;;  %v105_v10 = vld.sshfl [vmem:[#allocation1 + $0x20] sm:$0xff pattern:$0x73625140]  ;;  %v123_v16 = vpack.c.bf16 %v107_v12, %v107_v12  ;;  %v1382_v18 = vld [vmem:[#allocation7 + $0x38] sm:$0xff] }
  0x2d   :  { %647 = vmatpush.bf16.msra.mxu0 %v1312_v25  ;;  %v1367_v9 = vld [vmem:[#allocation5 + $0x1c0] sm:$0xff]  ;;  %v121_v14 = vpack.c.bf16 %v105_v10, %v105_v10  ;;  %v1381_v19 = vld [vmem:[#allocation7 + $0x30] sm:$0xff]  ;;  %v1380_v20 = vld [vmem:[#allocation7 + $0x28] sm:$0xff] }
  0x2e   :  { %660 = vmatpush.bf16.msra.mxu1 %v1320_v26  ;;  %v108_v13 = vld.sshfl [vmem:[#allocation1 + $0x38] sm:$0xff pattern:$0x73625140]  ;;  %v1378_v22 = vld [vmem:[#allocation7 + $0x18] sm:$0xff]  ;;  %v1377_v24 = vld [vmem:[#allocation7 + $0x10] sm:$0xff] }
  0x2f   :  { %673 = vmatpush.bf16.msra.mxu2 %v1328_v27  ;;  %v124_v17 = vpack.c.bf16 %v108_v13, %v108_v13  ;;  %v1379_v21 = vld [vmem:[#allocation7 + $0x20] sm:$0xff]  ;;  %v1376_v26 = vld [vmem:[#allocation7 + $0x8] sm:$0xff]  ;;  %v1389_v36 = vld [vmem:[#allocation8 + $0x30] sm:$0xff] }
  0x30   :  { %686 = vmatpush.bf16.msra.mxu3 %v1336_v28  ;;  %v1388_v38 = vld [vmem:[#allocation8 + $0x28] sm:$0xff] }
  0x31   :  { %648 = vmatpush.bf16.msra.mxu0 %v1311_v30  ;;  %v1375_v30 = vld [vmem:[#allocation7] sm:$0xff]  ;;  %v930_v13 = vld [vmem:[%s1656_s1] sm:$0x3]  ;;  %s1569_s1 = smov [#allocation10]  }
  0x32   :  { %661 = vmatpush.bf16.msra.mxu1 %v1319_v31  ;;  %s961_s14 = sshll.u32 %s1569_s1, 4  ;;  %s962_s14 = int_to_ptr.vmem [resolvable:$true] %s961_s14 }
  0x33   :  { %674 = vmatpush.bf16.msra.mxu2 %v1327_v32  ;;  %v1401_v32 = vld [vmem:[%s1658_s3] ss:$0 sm:$0xff] }
  0x34   :  { %687 = vmatpush.bf16.msra.mxu3 %v1335_v33  ;;  %649 = vmatmul.bf16.vlgmr.msra.gmra.mxu0 %v117_v43  ;;  %v1390_v33 = vld [vmem:[#allocation8 + $0x38] sm:$0xff] }
  0x35   :  { %693 = vmatpush.bf16.msrb.mxu0 %v1350_v34  ;;  %662 = vmatmul.bf16.vlgmr.msra.gmra.mxu1 %v118_v45 }
  0x36   :  { %706 = vmatpush.bf16.msrb.mxu1 %v1358_v35  ;;  %675 = vmatmul.bf16.vlgmr.msra.gmra.mxu2 %v119_v42  ;;  %v1386_v42 = vld [vmem:[#allocation8 + $0x18] sm:$0xff] }
  0x37   :  { %719 = vmatpush.bf16.msrb.mxu2 %v1366_v40  ;;  %688 = vmatmul.bf16.vlgmr.msra.gmra.mxu3 %v120_v44  ;;  %v1387_v40 = vld [vmem:[#allocation8 + $0x20] sm:$0xff] }
  0x38   :  { %732 = vmatpush.bf16.msrb.mxu3 %v1374_v41 }
  0x39   :  { %694 = vmatpush.bf16.msrb.mxu0 %v1349_v46 }
  0x3a   :  { %707 = vmatpush.bf16.msrb.mxu1 %v1357_v47  ;;  %v1385_v47 = vld [vmem:[#allocation8 + $0x10] sm:$0xff] }
  0x3b   :  { %720 = vmatpush.bf16.msrb.mxu2 %v1365_v48 }
  0x3c   :  { %733 = vmatpush.bf16.msrb.mxu3 %v1373_v49 }
  0x3d   :  { %695 = vmatpush.bf16.msrb.mxu0 %v1348_v50 }
  0x3e   :  { %708 = vmatpush.bf16.msrb.mxu1 %v1356_v51 }
  0x3f   :  { %721 = vmatpush.bf16.msrb.mxu2 %v1364_v52 }
  0x40   :  { %734 = vmatpush.bf16.msrb.mxu3 %v1372_v53 }
  0x41   :  { %696 = vmatpush.bf16.msrb.mxu0 %v1347_v54 }
  0x42   :  { %709 = vmatpush.bf16.msrb.mxu1 %v1355_v55 }
  0x43   :  { %722 = vmatpush.bf16.msrb.mxu2 %v1363_v56 }
  0x44   :  { %735 = vmatpush.bf16.msrb.mxu3 %v1371_v57 }
  0x45   :  { %697 = vmatpush.bf16.msrb.mxu0 %v1346_v58 }
  0x46   :  { %710 = vmatpush.bf16.msrb.mxu1 %v1354_v59  ;;  %v1384_v59 = vld [vmem:[#allocation8 + $0x8] sm:$0xff] }
  0x47   :  { %723 = vmatpush.bf16.msrb.mxu2 %v1362_v60  ;;  %v1383_v60 = vld [vmem:[#allocation8] sm:$0xff] }
  0x48   :  { %736 = vmatpush.bf16.msrb.mxu3 %v1370_v61  ;;  %v1402_v61 = vld [vmem:[%s1660_s5] ss:$0 sm:$0xff] }
  0x49   :  { %698 = vmatpush.bf16.msrb.mxu0 %v1345_v62 }
  0x4a   :  { %711 = vmatpush.bf16.msrb.mxu1 %v1353_v63 }
  0x4b   :  { %724 = vmatpush.bf16.msrb.mxu2 %v1361_v0 }
  0x4c   :  { %737 = vmatpush.bf16.msrb.mxu3 %v1369_v1 }
  0x4d   :  { %699 = vmatpush.bf16.msrb.mxu0 %v1344_v2 }
  0x4e   :  { %712 = vmatpush.bf16.msrb.mxu1 %v1352_v3  ;;  %v1568_v3 = vmov 0  }
  0x4f   :  { %725 = vmatpush.bf16.msrb.mxu2 %v1360_v4  ;;  %1400 = vset.pattern.permute.xlu0 %v1568_v3  ;;  %v913_v4 = vlaneseq }
  0x50   :  { %738 = vmatpush.bf16.msrb.mxu3 %v1368_v5 }
  0x51   :  { %700 = vmatpush.bf16.msrb.mxu0 %v1343_v6  ;;  %v914_v5 = vand.u32 127, %v913_v4  ;;  %v1403_v6 = vld [vmem:[%s1662_s7] ss:$0 sm:$0xff] }
  0x52   :  { %713 = vmatpush.bf16.msrb.mxu1 %v1351_v7 }
  0x53   :  { %726 = vmatpush.bf16.msrb.mxu2 %v1359_v8  ;;  %vm915_vm0 = vcmp.lt.s32.totalorder %v914_v5, 10 }
  0x54   :  { %739 = vmatpush.bf16.msrb.mxu3 %v1367_v9  ;;  %701 = vmatmul.bf16.vlgmr.msrb.gmra.mxu0 %v121_v14 }
  0x55   :  { %714 = vmatmul.bf16.vlgmr.msrb.gmra.mxu1 %v122_v15  ;;  %815 = vmatpush.bf16.msra.mxu0 %v1382_v18 }
  0x56   :  { %727 = vmatmul.bf16.vlgmr.msrb.gmra.mxu2 %v123_v16  ;;  %898 = vmatpush.bf16.msra.mxu1 %v1390_v33 }
  0x57   :  { %740 = vmatmul.bf16.vlgmr.msrb.gmra.mxu3 %v124_v17 }
  0x59   :  { %816 = vmatpush.bf16.msra.mxu0 %v1381_v19 }
  0x5a   :  { %899 = vmatpush.bf16.msra.mxu1 %v1389_v36 }
  0x5d   :  { %817 = vmatpush.bf16.msra.mxu0 %v1380_v20 }
  0x5e   :  { %900 = vmatpush.bf16.msra.mxu1 %v1388_v38 }
  0x61   :  { %818 = vmatpush.bf16.msra.mxu0 %v1379_v21 }
  0x62   :  { %901 = vmatpush.bf16.msra.mxu1 %v1387_v40 }
  0x65   :  { %819 = vmatpush.bf16.msra.mxu0 %v1378_v22 }
  0x66   :  { %902 = vmatpush.bf16.msra.mxu1 %v1386_v42 }
  0x69   :  { %820 = vmatpush.bf16.msra.mxu0 %v1377_v24  ;;  %v941_v24 = vshrl.u32 %v913_v4, 7 }
  0x6a   :  { %903 = vmatpush.bf16.msra.mxu1 %v1385_v47 }
  0x6b   :  { %vm944_vm3 = vcmp.lt.s32.totalorder %v941_v24, 2 }
  0x6d   :  { %821 = vmatpush.bf16.msra.mxu0 %v1376_v26 }
  0x6e   :  { %904 = vmatpush.bf16.msra.mxu1 %v1384_v59 }
  0x71   :  { %822 = vmatpush.bf16.msra.mxu0 %v1375_v30 }
  0x72   :  { %905 = vmatpush.bf16.msra.mxu1 %v1383_v60 }
  0xb1   :  { %v650_v23 = vpop.f32.mrf.mxu0 }
  0xb2   :  { %v663_v25 = vpop.f32.mrf.mxu1  ;;  %v651_v37 = vadd.f32 %v1401_v32, %v650_v23 }
  0xb4   :  { %v664_v39 = vadd.f32 %v663_v25, %v651_v37 }
  0xb9   :  { %v676_v27 = vpop.f32.mrf.mxu2  ;;  %v652_v29 = vpop.f32.mrf.mxu0 }
  0xba   :  { %v689_v28 = vpop.f32.mrf.mxu3  ;;  %v665_v31 = vpop.f32.mrf.mxu1  ;;  %v677_v41 = vadd.f32 %v676_v27, %v664_v39 }
  0xbc   :  { %v690_v43 = vadd.f32 %v689_v28, %v677_v41 }
  0xc1   :  { %v678_v34 = vpop.f32.mrf.mxu2 }
  0xc2   :  { %v691_v35 = vpop.f32.mrf.mxu3 }
  0xd1   :  { %v702_v44 = vpop.f32.mrf.mxu0 }
  0xd2   :  { %v715_v45 = vpop.f32.mrf.mxu1  ;;  %v703_v46 = vadd.f32 %v702_v44, %v690_v43 }
  0xd4   :  { %v716_v48 = vadd.f32 %v715_v45, %v703_v46 }
  0xd9   :  { %v728_v49 = vpop.f32.mrf.mxu2  ;;  %v704_v52 = vpop.f32.mrf.mxu0 }
  0xda   :  { %v741_v50 = vpop.f32.mrf.mxu3  ;;  %v729_v51 = vadd.f32 %v728_v49, %v716_v48  ;;  %v717_v53 = vpop.f32.mrf.mxu1 }
  0xdc   :  { %v742_v54 = vadd.f32 %v741_v50, %v729_v51 }
  0xde   :  { %v745_v55 = vmax.f32 %v742_v54, 0.0 }
  0xe0   :  { %v746_v56 = vpack.c.bf16 %v745_v55, %v745_v55 }
  0xe1   :  { %v730_v57 = vpop.f32.mrf.mxu2 }
  0xe2   :  { %v743_v58 = vpop.f32.mrf.mxu3  ;;  %823 = vmatmul.bf16.vlgmr.msra.gmra.mxu0 %v746_v56 }
 0x15f   :  { %v824_v62 = vpop.f32.mrf.mxu0 }
 0x160   :  { %v825_v63 = vadd.f32 %v1402_v61, %v824_v62 }
 0x162   :  { %v828_v0 = vmax.f32 %v825_v63, 0.0 }
 0x164   :  { %v829_v1 = vpack.c.bf16 %v828_v0, %v828_v0 }
 0x166   :  { %906 = vmatmul.bf16.vlgmr.msra.gmra.mxu1 %v829_v1 }
 0x167   :  { %v826_v2 = vpop.f32.mrf.mxu0 }
 0x1e3   :  { %v907_v7 = vpop.f32.mrf.mxu1 }
 0x1e4   :  { %v908_v8 = vadd.f32 %v1403_v6, %v907_v7 }
 0x1e6   :  { %v911_v9 = vpack.c.bf16 %v908_v8, %v908_v8  ;;  %v916_v10 = vsel %vm915_vm0, %v908_v8, -1e+30 }
 0x1e7   :  { %v918_v11 = vsel %vm917_vm1, %v916_v10, -inf }
 0x1e8   :  { %912 = vst [vmem:[#allocation10] sm:$0x1] %v911_v9  ;;  %919 = vmax.xlane.f32.xlu0 %v918_v11 }
 0x1e9   :  { %966 = dma.vmem_to_hbm [thread:$0]  %s962_s14, 16, %s964_s13, [#allocation4]  }
 0x1eb   :  { %v909_v12 = vpop.f32.mrf.mxu1 }
 0x1fc   :  { %932 = vperm.xlu0 %1400, %v930_v13  }
 0x25b   :  { %v920_v14 = vpop.xlane.xlu0 %919 }
 0x25c   :  { %v921_v15 = vsub.f32 %v916_v10, %v920_v14 }
 0x25e   :  { %v922_v16 = vmul.f32 1.442695, %v921_v15 }
 0x260   :  { %1404 = vpow2.f32 %v922_v16 }
 0x266   :  { %v1405_v17 = vpop.eup %1404 }
 0x267   :  { %v924_v18 = vsel %vm917_vm1, %v1405_v17, 0.0 }
 0x268   :  { %925 = vadd.xlane.f32.xlu1 %v924_v18 }
 0x26e   :  { %v933_v19 = vpop.permute.xlu0 %932 }
 0x26f   :  { %vm934_vm2 = vcmp.eq.s32.totalorder %v914_v5, %v933_v19 }
 0x270   :  { %v935_v20 = vsel %vm934_vm2, %v908_v8, 0.0 }
 0x271   :  { %v936_v21 = vsel %vm917_vm1, %v935_v20, 0.0 }
 0x272   :  { %937 = vadd.xlane.f32.xlu1 %v936_v21 }
 0x2db   :  { %v926_v22 = vpop.xlane.xlu1 %925 }
 0x2dc   :  { %1406 = vlog2.f32 %v926_v22 }
 0x2e2   :  { %v1407_v23 = vpop.eup %1406 }
 0x2e3   :  { %v928_v25 = vmul.f32 0.6931472, %v1407_v23 }
 0x2e5   :  { %v929_v26 = vadd.f32 %v928_v25, %v920_v14  ;;  %v938_v27 = vpop.xlane.xlu1 %937 }
 0x2e7   :  { %v945_v28 = vsub.f32 %v929_v26, %v938_v27 }
 0x2e9   :  { %v946_v29 = vsel %vm944_vm3, %v945_v28, 0.0 }
 0x2ea   :  { %v947_v30 = vsel %vm917_vm1, %v946_v29, 0.0 }
 0x2eb   :  { %v948_v31 = vrot.slane %v947_v30, 4 }
 0x2ed   :  { %v949_v32 = vadd.f32 %v948_v31, %v947_v30 }
 0x2ef   :  { %v950_v33 = vrot.slane %v949_v32, 2 }
 0x2f1   :  { %v951_v34 = vadd.f32 %v950_v33, %v949_v32 }
 0x2f3   :  { %v952_v35 = vrot.slane %v951_v34, 1 }
 0x2f5   :  { %v953_v36 = vadd.f32 %v952_v35, %v951_v34 }
 0x2f7   :  { %955 = vst.msk [vmem:[#allocation11] sm:$0x1] %vm954_vm4, %v953_v36 }
 0x2f8   :  { %977 = dma.vmem_to_hbm [thread:$0]  %s973_s15, 16, %s975_s18, [#allocation12]  }
 0x2f9   :  { %1558 = dma.done.wait [#allocation4], 16  }
 0x2fa   :  { %1559 = vsyncadd [#allocation4], 4294967280 }
 0x2fb   :  { %1560 = dma.done.wait [#allocation12], 16  }
 0x2fc   :  { %1561 = vsyncadd [#allocation12], 4294967280 }
 0x2fd   :  { %986 = vsyncpa [#allocation3], 1 }
 0x2fe   :  { %987 = vsyncpa [#allocation6], 1 }
 0x2ff   :  { %988 = vsyncpa [#allocation9], 1 }
 0x300   :  { %989 = vsyncpa [#allocation4], 1 }
 0x301   :  { %990 = vsyncpa [#allocation12], 1 }

</bundles_post_ra>
